<compile_context>
chip_gen: v7x
topology: tpu7x:2x2x1
jax: 0.10.0
libtpu: 0.0.40
codegen_flags: <defaults>
</compile_context>

<pallas_src>
import functools

import jax
import jax.numpy as jnp
from jax.experimental import pallas as pl
from jax.experimental.pallas import tpu as pltpu


# ----------------------------------------------------------------------------
# Helpers
# ----------------------------------------------------------------------------
def _cdiv(a, b):
    return (a + b - 1) // b


def _round_up(n, m):
    return _cdiv(n, m) * m


def _l2_normalize(v, eps=1e-12):
    return v / (jnp.linalg.norm(v) + eps)


def spectral_normalize(w, u):
    """One PyTorch-style power iteration.  w: [out, in], u: [out]."""
    v = _l2_normalize(w.T @ u)          # [in]
    u_new = _l2_normalize(w @ v)        # [out]
    sigma = u_new @ (w @ v)             # scalar
    return w / sigma, u_new


# ----------------------------------------------------------------------------
# Fused Pallas kernel: whole MLP, activation carried in vregs
# ----------------------------------------------------------------------------
def _fused_mlp_kernel(x_ref, w0_ref, wr_ref, b_ref, o_ref, *,
                      n_layers, negative_slope):
    # x_ref:  (tm, K)        f32  input batch tile (feature dim NOT padded)
    # w0_ref: (K, F)         bf16 first-layer weight [in, out] (out padded)
    # wr_ref: (max(L-1,1), F, F) bf16 remaining weights [in, out] (padded)
    # b_ref:  (L, 1, F)      f32  biases (padded lanes are zero)
    # o_ref:  (tm, F)        f32  lane-dense output slab
    ns = jnp.float32(negative_slope)

    # Layer 0 reads the input tile directly (no zero-fill needed: the
    # contraction dim is exactly K).
    act = jnp.dot(x_ref[...].astype(jnp.bfloat16), w0_ref[...],
                  preferred_element_type=jnp.float32) + b_ref[0]
    if n_layers > 1:
        act = jnp.where(act >= 0.0, act, ns * act)        # LeakyReLU(0.2)

    for layer in range(1, n_layers):                       # unrolled, L small
        act = jnp.dot(act.astype(jnp.bfloat16), wr_ref[layer - 1],
                      preferred_element_type=jnp.float32) + b_ref[layer]
        if layer < n_layers - 1:                           # hidden layers only
            act = jnp.where(act >= 0.0, act, ns * act)

    o_ref[...] = act.astype(o_ref.dtype)


def _choose_tile(M, tm_max=1024, min_split=128):
    """Balanced batch tile; guarantee >=2 grid steps (v7x dual-TC) when M is
    large enough that both halves still amortize per-step overhead."""
    n_tiles = max(1, _cdiv(M, tm_max))
    if n_tiles < 2 and M >= 2 * min_split:
        n_tiles = 2
    tm = _round_up(_cdiv(M, n_tiles), 8)
    m_pad = _round_up(M, tm)
    return tm, m_pad


def fused_mlp_pallas(x, w0, wr, b_stack, out_size, *,
                     negative_slope=0.2, tm_max=1024):
    """x: [M, K] f32.  w0: [K, F] bf16.  wr: [max(L-1,1), F, F] bf16.
    b_stack: [L, 1, F] f32."""
    M, K = x.shape
    L = b_stack.shape[0]
    F = w0.shape[1]
    assert w0.shape[0] == K
    assert wr.shape[1:] == (F, F)
    assert b_stack.shape == (L, 1, F)
    assert out_size <= F

    tm, M_pad = _choose_tile(M, tm_max)

    x_pad = x.astype(jnp.float32)
    if M_pad != M:                                   # cheap row-only pad
        x_pad = jnp.pad(x_pad, ((0, M_pad - M), (0, 0)))

    kernel = functools.partial(_fused_mlp_kernel, n_layers=L,
                               negative_slope=negative_slope)

    # Explicit VMEM budget (double-buffered x/out tiles + resident params),
    # with headroom; capped well under v7x's 64 MiB physical VMEM.
    vmem_bytes = (2 * tm * K * 4 + 2 * tm * F * 4
                  + w0.size * w0.dtype.itemsize
                  + wr.size * wr.dtype.itemsize
                  + b_stack.size * b_stack.dtype.itemsize)
    vmem_limit = int(min(max(2 * vmem_bytes, 16 * 1024 * 1024),
                         48 * 1024 * 1024))

    # Whole-array VMEM operands: resident, single copy, no double-buffering.
    resident = pl.BlockSpec(memory_space=pltpu.MemorySpace.VMEM)

    out = pl.pallas_call(
        kernel,
        out_shape=jax.ShapeDtypeStruct((M_pad, F), jnp.float32),
        grid_spec=pltpu.PrefetchScalarGridSpec(
            num_scalar_prefetch=0,
            grid=(M_pad // tm,),
            in_specs=[
                pl.BlockSpec((tm, K), lambda i: (i, 0)),   # batch tile
                resident,                                   # w0  (K, F)
                resident,                                   # wr  (L-1, F, F)
                resident,                                   # b   (L, 1, F)
            ],
            out_specs=pl.BlockSpec((tm, F), lambda i: (i, 0)),
        ),
        compiler_params=pltpu.CompilerParams(
            dimension_semantics=("parallel",),
            vmem_limit_bytes=vmem_limit),
    )(x_pad, w0, wr, b_stack)

    return out[:M, :out_size]


# ----------------------------------------------------------------------------
# MLP_g parameters (PyTorch-Linear-style) + one-time packing for the kernel
# ----------------------------------------------------------------------------
def init_mlp_g_params(key, input_size, n_hidden, hidden_size, output_size):
    params = []
    in_f = input_size
    for _ in range(n_hidden):
        key, kw, kb = jax.random.split(key, 3)
        bound = 1.0 / jnp.sqrt(in_f)
        w = jax.random.uniform(kw, (hidden_size, in_f), jnp.float32,
                               -bound, bound)
        b = jax.random.uniform(kb, (hidden_size,), jnp.float32, -bound, bound)
        params.append((w, b))
        in_f = hidden_size
    key, kw, kb, ku = jax.random.split(key, 4)
    bound = 1.0 / jnp.sqrt(hidden_size)
    w_out = jax.random.uniform(kw, (output_size, hidden_size), jnp.float32,
                               -bound, bound)
    b_out = jax.random.uniform(kb, (output_size,), jnp.float32, -bound, bound)
    u = _l2_normalize(jax.random.normal(ku, (output_size,), jnp.float32))
    return params, (w_out, b_out, u)


def pack_mlp_g_params(hidden_params, out_params, weights_dtype=jnp.bfloat16):
    """One-time prep: spectral-normalize the head, transpose to [in,out],
    zero-pad outputs (and layer>=1 inputs) to a lane-dense width F, stack,
    and cast weights to bf16 for the MXU.  Layer-0 keeps its true
    contraction dim K so the wrapper never pads the feature dim of x."""
    w_out, b_out, u = out_params
    w_sn, _ = spectral_normalize(w_out, u)        # fold 1/sigma once, here
    layers = list(hidden_params) + [(w_sn, b_out)]
    L = len(layers)

    # Padded width F covers every dim except layer-0's input dim K.
    dims = [layers[0][0].shape[0]]                # layer-0 output dim
    for w, _ in layers[1:]:
        dims.extend([w.shape[0], w.shape[1]])
    max_dim = max(dims)
    # v6e/v7x MXUs are 256x256: use 256 multiples once dims reach 256;
    # for small nets (and v5e's 128x128 MXU) 128 is already optimal.
    F = _round_up(max_dim, 256 if max_dim >= 256 else 128)
    K = layers[0][0].shape[1]                      # true input feature dim

    w0 = jnp.zeros((K, F), jnp.float32)
    w0 = w0.at[:, :layers[0][0].shape[0]].set(layers[0][0].T)   # [in, out]
    wr = jnp.zeros((max(L - 1, 1), F, F), jnp.float32)
    b_stack = jnp.zeros((L, 1, F), jnp.float32)
    b_stack = b_stack.at[0, 0, :layers[0][1].shape[0]].set(layers[0][1])
    for i, (w, b) in enumerate(layers[1:], start=1):
        wt = w.T                                   # [in, out]
        wr = wr.at[i - 1, :wt.shape[0], :wt.shape[1]].set(wt)
        b_stack = b_stack.at[i, 0, :b.shape[0]].set(b)

    return (w0.astype(weights_dtype), wr.astype(weights_dtype), b_stack, F)


def mlp_g_forward(x, w0, wr, b_stack, output_size):
    return fused_mlp_pallas(x, w0, wr, b_stack, output_size,
                            negative_slope=0.2)


# ----------------------------------------------------------------------------
# Pure-jnp references for correctness
# ----------------------------------------------------------------------------
def _mlp_ref_from_layers(x, layers_wb, negative_slope=0.2):
    h = x
    n = len(layers_wb)
    for i, (w, b) in enumerate(layers_wb):
        h = h @ w.T + b
        if i < n - 1:
            h = jnp.where(h >= 0.0, h, negative_slope * h)
    return h


def mlp_g_reference(x, hidden_params, out_params):
    """Exact f32 reference (PyTorch numerics)."""
    w_out, b_out, u = out_params
    w_sn, _ = spectral_normalize(w_out, u)
    return _mlp_ref_from_layers(x, list(hidden_params) + [(w_sn, b_out)])


def mlp_g_reference_bf16w(x, hidden_params, out_params):
    """Reference with the same bf16-rounded weights the kernel uses
    (isolates the activation-cast error for a tight check)."""
    w_out, b_out, u = out_params
    w_sn, _ = spectral_normalize(w_out, u)
    q = lambda w: w.astype(jnp.bfloat16).astype(jnp.float32)
    layers = [(q(w), b) for (w, b) in hidden_params] + [(q(w_sn), b_out)]
    return _mlp_ref_from_layers(x, layers)


if __name__ == "__main__":
    key = jax.random.PRNGKey(0)
    key, kx, kx2, kp = jax.random.split(key, 4)

    batch = 8
    input_size = 16
    n_hidden = 2
    hidden_size = 32
    output_size = 16

    hidden_params, out_params = init_mlp_g_params(
        kp, input_size, n_hidden, hidden_size, output_size)

    # one-time packing (spectral norm + transpose + pad + bf16 cast)
    w0, wr, b_stack, _F = pack_mlp_g_params(hidden_params, out_params)

    # small example consistent with the module
    x = jax.random.normal(kx, (batch, input_size), jnp.float32)
    out = jax.block_until_ready(
        mlp_g_forward(x, w0, wr, b_stack, output_size))
    assert out.shape == (batch, output_size)
    ref_q = mlp_g_reference_bf16w(x, hidden_params, out_params)
    ref_f = mlp_g_reference(x, hidden_params, out_params)
    assert jnp.allclose(out, ref_q, atol=2e-2, rtol=2e-2)     # tight (bf16-w ref)
    assert jnp.allclose(out, ref_f, atol=5e-2, rtol=5e-2)     # loose (exact f32 ref)

    # larger, non-tile-multiple batch: exercises the balanced 2-tile split
    # (152+152 rows -> both v7x TensorCores busy, minimal padding)
    x2 = jax.random.normal(kx2, (300, input_size), jnp.float32)
    out2 = jax.block_until_ready(
        mlp_g_forward(x2, w0, wr, b_stack, output_size))
    assert out2.shape == (300, output_size)
    ref2_q = mlp_g_reference_bf16w(x2, hidden_params, out_params)
    ref2_f = mlp_g_reference(x2, hidden_params, out_params)
    assert jnp.allclose(out2, ref2_q, atol=2e-2, rtol=2e-2)
    assert jnp.allclose(out2, ref2_f, atol=5e-2, rtol=5e-2)

    print("KERNEL_OK")
</pallas_src>

<mosaic_0001>
module attributes {stable_mosaic.version = 11 : i64} {
  func.func @_fused_mlp_kernel(%arg0: i32, %arg1: memref<8x16xf32, #tpu.memory_space<vmem>>, %arg2: memref<16x128xbf16, #tpu.memory_space<vmem>>, %arg3: memref<2x128x128xbf16, #tpu.memory_space<vmem>>, %arg4: memref<3x1x128xf32, #tpu.memory_space<vmem>>, %arg5: memref<8x128xf32, #tpu.memory_space<vmem>>) attributes {dimension_semantics = [#tpu.dimension_semantics<parallel>], iteration_bounds = array<i64: 1>, scalar_prefetch = 0 : i64, scratch_operands = 0 : i64, tpu.core_type = #tpu.core_type<tc>, window_params = [{transform_indices = @transform_0, window_bounds = array<i64: 8, 16>}, {pipeline_mode = #tpu.pipeline_mode<synchronous>, transform_indices = @transform_1, window_bounds = array<i64: 16, 128>}, {pipeline_mode = #tpu.pipeline_mode<synchronous>, transform_indices = @transform_2, window_bounds = array<i64: 2, 128, 128>}, {pipeline_mode = #tpu.pipeline_mode<synchronous>, transform_indices = @transform_3, window_bounds = array<i64: 3, 1, 128>}, {transform_indices = @transform_4, window_bounds = array<i64: 8, 128>}]} {
    %c0 = arith.constant 0 : index
    %c0_0 = arith.constant 0 : index
    %0 = vector.load %arg1[%c0, %c0_0] : memref<8x16xf32, #tpu.memory_space<vmem>>, vector<8x16xf32>
    %1 = arith.truncf %0 : vector<8x16xf32> to vector<8x16xbf16>
    %c0_1 = arith.constant 0 : index
    %c0_2 = arith.constant 0 : index
    %2 = vector.load %arg2[%c0_1, %c0_2] : memref<16x128xbf16, #tpu.memory_space<vmem>>, vector<16x128xbf16>
    %cst = arith.constant dense<0.000000e+00> : vector<8x128xf32>
    %3 = tpu.matmul %1, %2, %cst {dimension_numbers = #tpu.dot_dimension_numbers<[1], [0], [0], [1], [0, 0, 1, 1], [], []>} : vector<8x16xbf16>, vector<16x128xbf16>, vector<8x128xf32> -> vector<8x128xf32>
    %c0_3 = arith.constant 0 : index
    %c0_4 = arith.constant 0 : index
    %c0_5 = arith.constant 0 : index
    %4 = vector.load %arg4[%c0_3, %c0_4, %c0_5] : memref<3x1x128xf32, #tpu.memory_space<vmem>>, vector<1x1x128xf32>
    %5 = vector.shape_cast %4 : vector<1x1x128xf32> to vector<1x128xf32>
    %6 = vector.broadcast %5 : vector<1x128xf32> to vector<8x128xf32>
    %7 = arith.addf %3, %6 : vector<8x128xf32>
    %cst_6 = arith.constant 0.000000e+00 : f32
    %8 = vector.broadcast %cst_6 : f32 to vector<8x128xf32>
    %9 = arith.cmpf oge, %7, %8 : vector<8x128xf32>
    %cst_7 = arith.constant 2.000000e-01 : f32
    %10 = vector.broadcast %cst_7 : f32 to vector<8x128xf32>
    %11 = arith.mulf %10, %7 : vector<8x128xf32>
    %12 = arith.select %9, %7, %11 : vector<8x128xi1>, vector<8x128xf32>
    %13 = arith.truncf %12 : vector<8x128xf32> to vector<8x128xbf16>
    %c0_8 = arith.constant 0 : index
    %c0_9 = arith.constant 0 : index
    %c0_10 = arith.constant 0 : index
    %14 = vector.load %arg3[%c0_8, %c0_9, %c0_10] : memref<2x128x128xbf16, #tpu.memory_space<vmem>>, vector<1x128x128xbf16>
    %15 = vector.shape_cast %14 : vector<1x128x128xbf16> to vector<128x128xbf16>
    %cst_11 = arith.constant dense<0.000000e+00> : vector<8x128xf32>
    %16 = tpu.matmul %13, %15, %cst_11 {dimension_numbers = #tpu.dot_dimension_numbers<[1], [0], [0], [1], [0, 0, 1, 1], [], []>} : vector<8x128xbf16>, vector<128x128xbf16>, vector<8x128xf32> -> vector<8x128xf32>
    %c1 = arith.constant 1 : index
    %c0_12 = arith.constant 0 : index
    %c0_13 = arith.constant 0 : index
    %17 = vector.load %arg4[%c1, %c0_12, %c0_13] : memref<3x1x128xf32, #tpu.memory_space<vmem>>, vector<1x1x128xf32>
    %18 = vector.shape_cast %17 : vector<1x1x128xf32> to vector<1x128xf32>
    %19 = vector.broadcast %18 : vector<1x128xf32> to vector<8x128xf32>
    %20 = arith.addf %16, %19 : vector<8x128xf32>
    %cst_14 = arith.constant 0.000000e+00 : f32
    %21 = vector.broadcast %cst_14 : f32 to vector<8x128xf32>
    %22 = arith.cmpf oge, %20, %21 : vector<8x128xf32>
    %cst_15 = arith.constant 2.000000e-01 : f32
    %23 = vector.broadcast %cst_15 : f32 to vector<8x128xf32>
    %24 = arith.mulf %23, %20 : vector<8x128xf32>
    %25 = arith.select %22, %20, %24 : vector<8x128xi1>, vector<8x128xf32>
    %26 = arith.truncf %25 : vector<8x128xf32> to vector<8x128xbf16>
    %c1_16 = arith.constant 1 : index
    %c0_17 = arith.constant 0 : index
    %c0_18 = arith.constant 0 : index
    %27 = vector.load %arg3[%c1_16, %c0_17, %c0_18] : memref<2x128x128xbf16, #tpu.memory_space<vmem>>, vector<1x128x128xbf16>
    %28 = vector.shape_cast %27 : vector<1x128x128xbf16> to vector<128x128xbf16>
    %cst_19 = arith.constant dense<0.000000e+00> : vector<8x128xf32>
    %29 = tpu.matmul %26, %28, %cst_19 {dimension_numbers = #tpu.dot_dimension_numbers<[1], [0], [0], [1], [0, 0, 1, 1], [], []>} : vector<8x128xbf16>, vector<128x128xbf16>, vector<8x128xf32> -> vector<8x128xf32>
    %c2 = arith.constant 2 : index
    %c0_20 = arith.constant 0 : index
    %c0_21 = arith.constant 0 : index
    %30 = vector.load %arg4[%c2, %c0_20, %c0_21] : memref<3x1x128xf32, #tpu.memory_space<vmem>>, vector<1x1x128xf32>
    %31 = vector.shape_cast %30 : vector<1x1x128xf32> to vector<1x128xf32>
    %32 = vector.broadcast %31 : vector<1x128xf32> to vector<8x128xf32>
    %33 = arith.addf %29, %32 : vector<8x128xf32>
    %c0_22 = arith.constant 0 : index
    %c0_23 = arith.constant 0 : index
    %34 = vector.load %arg5[%c0_22, %c0_23] : memref<8x128xf32, #tpu.memory_space<vmem>>, vector<8x128xf32>
    tpu.vector_store %arg5[%c0_22, %c0_23], %33 {strides = array<i32>} : memref<8x128xf32, #tpu.memory_space<vmem>>, vector<8x128xf32>,
    return
  }
  func.func @transform_0(%arg0: i32) -> (i32, i32) {
    %c0_i32 = arith.constant 0 : i32
    %c0_i32_0 = arith.constant 0 : i32
    return %arg0, %c0_i32 : i32, i32
  }
  func.func @transform_1(%arg0: i32) -> (i32, i32) {
    %c0_i32 = arith.constant 0 : i32
    %c0_i32_0 = arith.constant 0 : i32
    %c0_i32_1 = arith.constant 0 : i32
    return %c0_i32, %c0_i32_0 : i32, i32
  }
  func.func @transform_2(%arg0: i32) -> (i32, i32, i32) {
    %c0_i32 = arith.constant 0 : i32
    %c0_i32_0 = arith.constant 0 : i32
    %c0_i32_1 = arith.constant 0 : i32
    %c0_i32_2 = arith.constant 0 : i32
    return %c0_i32, %c0_i32_0, %c0_i32_1 : i32, i32, i32
  }
  func.func @transform_3(%arg0: i32) -> (i32, i32, i32) {
    %c0_i32 = arith.constant 0 : i32
    %c0_i32_0 = arith.constant 0 : i32
    %c0_i32_1 = arith.constant 0 : i32
    %c0_i32_2 = arith.constant 0 : i32
    return %c0_i32, %c0_i32_0, %c0_i32_1 : i32, i32, i32
  }
  func.func @transform_4(%arg0: i32) -> (i32, i32) {
    %c0_i32 = arith.constant 0 : i32
    %c0_i32_0 = arith.constant 0 : i32
    return %arg0, %c0_i32 : i32, i32
  }
}

</mosaic_0001>

<bundles_post_ra>
// kernel: tpu_custom_call.1
= control target key start
LH: loop header
LB: loop body
LE: loop exit
PB: predicated region body
PF: predicated region fallthrough
CT: control target
= control target key end

     0   :  { %9 = vsyncpa [#allocation3], 0  ;;  %s693_s0 = inlined_call_operand.hbm [shape: f32[8,16], index: 0, kind: input, shape index: {}]   ;;  %s694_s1 = inlined_call_operand.hbm [shape: bf16[16,128], index: 1, kind: input, shape index: {}]   ;;  %s695_s2 = inlined_call_operand.hbm [shape: bf16[2,128,128], index: 2, kind: input, shape index: {}]   ;;  %s696_s3 = inlined_call_operand.vmem [shape: f32[3,1,128], index: 3, kind: input, shape index: {}]   ;;  %s697_s4 = inlined_call_operand.hbm [shape: f32[8,128], index: 4, kind: output, shape index: {}]  }
   0x1   :  { %10 = vsyncpa [#allocation6], 0 }
   0x2   :  { %11 = vsyncpa [#allocation4], 0  ;;  %s577_s15 = smov [#allocation5]   ;;  %s483_s19 = scalar_lea.hbm %s694_s1, 128 }
   0x3   :  { %s27_s16 = sshll.u32 %s577_s15, 4  ;;  %p484_p0 = scmp.ne.s32.totalorder %s694_s1, %s483_s19  ;;  %s28_s16 = int_to_ptr.vmem [resolvable:$true] %s27_s16 }
   0x4   :  { %p487_p1 = scmp.lt.u32.totalorder %s483_s19, %s694_s1 }
   0x6   :  { %p489_p2 = pnand %p487_p1, %p484_p0 }
   0x8   :  { %492 = shalt.err (!%p489_p2)
}
   0x9   :  { %s493_s24 = scalar_lea.vmem %s28_s16, 128  ;;  %p498_p4 = scmp.lt.s32.totalorder %s28_s16, %s28_s16 }
   0xa   :  { %p494_p3 = scmp.ne.s32.totalorder %s28_s16, %s493_s24  ;;  %p499_p5 = scmp.lt.s32.totalorder %s493_s24, %s493_s24 }
   0xc   :  { %p500_p6 = por %p499_p5, %p498_p4 }
   0xe   :  { %p501_p7 = pnand %p500_p6, %p494_p3 }
  0x10   :  { %504 = shalt.err (!%p501_p7)
}
  0x11   :  { %s578_s25 = smov 64   ;;  %s579_s26 = smov 4  }
  0x12   :  { %33 = dma.hbm_to_vmem [thread:$0]  %s694_s1, 128, %s28_s16, [#allocation6], %s578_s25, %s578_s25, %s579_s26  }
  0x13   :  { %s580_s29 = smov [#allocation2]   ;;  %s581_s5 = smov [#allocation7]  }
  0x14   :  { %s18_s30 = sshll.u32 %s580_s29, 4  ;;  %s39_s6 = sshll.u32 %s581_s5, 4  ;;  %s19_s30 = int_to_ptr.vmem [resolvable:$true] %s18_s30  ;;  %s40_s6 = int_to_ptr.vmem [resolvable:$true] %s39_s6 }
  0x15   :  { %s505_s9 = scalar_lea.hbm %s693_s0, 128 }
  0x16   :  { %p506_p8 = scmp.ne.s32.totalorder %s693_s0, %s505_s9  ;;  %p509_p9 = scmp.lt.u32.totalorder %s505_s9, %s693_s0 }
  0x18   :  { %p511_p10 = pnand %p509_p9, %p506_p8 }
  0x1a   :  { %514 = shalt.err (!%p511_p10)
}
  0x1b   :  { %s515_s1 = scalar_lea.vmem %s19_s30, 128  ;;  %p520_p12 = scmp.lt.s32.totalorder %s19_s30, %s19_s30 }
  0x1c   :  { %p516_p11 = scmp.ne.s32.totalorder %s19_s30, %s515_s1  ;;  %p521_p13 = scmp.lt.s32.totalorder %s515_s1, %s515_s1 }
  0x1e   :  { %p522_p0 = por %p521_p13, %p520_p12 }
  0x20   :  { %p523_p1 = pnand %p522_p0, %p516_p11 }
  0x22   :  { %526 = shalt.err (!%p523_p1)
}
  0x23   :  { %21 = dma.hbm_to_vmem [thread:$0]  %s693_s0, 128, %s19_s30, [#allocation3]  }
  0x24   :  { %s527_s18 = scalar_lea.hbm %s695_s2, 2048 }
  0x25   :  { %p528_p2 = scmp.ne.s32.totalorder %s695_s2, %s527_s18  ;;  %p531_p3 = scmp.lt.u32.totalorder %s527_s18, %s695_s2 }
  0x27   :  { %p533_p4 = pnand %p531_p3, %p528_p2 }
  0x29   :  { %536 = shalt.err (!%p533_p4)
}
  0x2a   :  { %s537_s23 = scalar_lea.vmem %s40_s6, 2048  ;;  %p542_p6 = scmp.lt.s32.totalorder %s40_s6, %s40_s6 }
  0x2b   :  { %p538_p5 = scmp.ne.s32.totalorder %s40_s6, %s537_s23  ;;  %p543_p7 = scmp.lt.s32.totalorder %s537_s23, %s537_s23 }
  0x2d   :  { %p544_p8 = por %p543_p7, %p542_p6 }
  0x2f   :  { %p545_p9 = pnand %p544_p8, %p538_p5 }
  0x31   :  { %548 = shalt.err (!%p545_p9)
}
  0x32   :  { %45 = dma.hbm_to_vmem [thread:$0]  %s695_s2, 2048, %s40_s6, [#allocation6], %s578_s25, %s578_s25, %s579_s26  }
  0x33   :  { %571 = dma.done.wait [#allocation3], 128  }
  0x34   :  { %572 = vsyncadd [#allocation3], 4294967168 }
  0x35   :  { %573 = dma.done.wait [#allocation6], 2176  }
  0x36   :  { %574 = vsyncadd [#allocation6], 4294965120  ;;  %v582_v0 = vmov 0.0   ;;  %vm583_vm0 = vmmov 0   ;;  %v466_v1 = vld [vmem:[#allocation5] sm:$0xff]   ;;  %v58_v2 = vld [vmem:[#allocation2] sm:$0xff] }
  0x37   :  { %412 = vmatprep.subr.bf16.mxu0 %v582_v0  ;;  %414 = vmatprep.mubr.msk.bf16.mxu0 %vm583_vm0, %v582_v0  ;;  %v59_v3 = vpack.c.bf16 %v58_v2, %v58_v2  ;;  %vm75_vm1 = vcmask 130048   ;;  %v467_v4 = vld [vmem:[#allocation7] sm:$0xff]   ;;  %v468_v5 = vld [vmem:[#allocation7 + $0x8] sm:$0xff]   ;;  %v469_v6 = vld [vmem:[#allocation7 + $0x10] sm:$0xff]   ;;  %s584_s30 = smov [#allocation8]  }
  0x38   :  { %418 = vmatprep.subr.bf16.mxu1 %v582_v0  ;;  %434 = vmatprep.mubr.msk.bf16.mxu1 %vm583_vm0, %v582_v0  ;;  %v470_v7 = vld [vmem:[#allocation7 + $0x18] sm:$0xff]   ;;  %v471_v8 = vld [vmem:[#allocation7 + $0x20] sm:$0xff]   ;;  %v472_v9 = vld [vmem:[#allocation7 + $0x28] sm:$0xff]   ;;  %s359_s5 = sshll.u32 %s584_s30, 4  ;;  %s360_s5 = int_to_ptr.vmem [resolvable:$true] %s359_s5 }
  0x39   :  { %413 = vmatpush3.bf16.msra.mxu0 %v466_v1  ;;  %419 = vmatpush3.bf16.msra.mxu1 %v467_v4  ;;  %v473_v10 = vld [vmem:[#allocation7 + $0x30] sm:$0xff]   ;;  %v474_v11 = vld [vmem:[#allocation7 + $0x38] sm:$0xff]   ;;  %v475_v12 = vld [vmem:[#allocation7 + $0x40] sm:$0xff]   ;;  %s549_s6 = scalar_lea.vmem %s360_s5, 128  ;;  %p554_p11 = scmp.lt.s32.totalorder %s360_s5, %s360_s5 }
  0x3a   :  { %438 = vmatprep.subr.bf16.mxu0 %v582_v0  ;;  %420 = vmatprep.subr.bf16.mxu1 %v582_v0  ;;  %v476_v13 = vld [vmem:[#allocation7 + $0x48] sm:$0xff]   ;;  %v477_v14 = vld [vmem:[#allocation7 + $0x50] sm:$0xff]   ;;  %v478_v15 = vld [vmem:[#allocation7 + $0x58] sm:$0xff]   ;;  %p550_p10 = scmp.ne.s32.totalorder %s360_s5, %s549_s6  ;;  %p555_p12 = scmp.lt.s32.totalorder %s549_s6, %s549_s6 }
  0x3b   :  { %v479_v16 = vld [vmem:[#allocation7 + $0x60] sm:$0xff]   ;;  %v480_v17 = vld [vmem:[#allocation7 + $0x68] sm:$0xff]   ;;  %v369_v18 = vld [vmem:[%s696_s3] ss:$0 sm:$0xff] }
  0x3c   :  { %415 = vmatmul.mubr.msk.bf16.vlgmr.msra.gmra.mrb[0].mxu0 %vm75_vm1, %v59_v3  ;;  %v481_v27 = vld [vmem:[#allocation7 + $0x70] sm:$0xff]   ;;  %v482_v28 = vld [vmem:[#allocation7 + $0x78] sm:$0xff]   ;;  %p556_p13 = por %p555_p12, %p554_p11 }
  0x3d   :  { %454 = vmatprep.mubr.msk.bf16.mxu0 %vm583_vm0, %v582_v0  ;;  %421 = vmatpush3.bf16.msra.mxu1 %v468_v5  ;;  %v373_v29 = vld [vmem:[%s696_s3 + $0x1] ss:$0 sm:$0xff]  ;;  %v383_v38 = vld [vmem:[%s696_s3 + $0x2] ss:$0 sm:$0xff] }
  0x3e   :  { %422 = vmatprep.subr.bf16.mxu1 %v582_v0  ;;  %439 = vmatpush3.bf16.msra.mxu0 %v475_v12  ;;  %p557_p0 = pnand %p556_p13, %p550_p10 }
  0x3f   :  { %440 = vmatprep.subr.bf16.mxu0 %v582_v0 }
  0x41   :  { %423 = vmatpush3.bf16.msra.mxu1 %v469_v6 }
  0x42   :  { %424 = vmatprep.subr.bf16.mxu1 %v582_v0  ;;  %441 = vmatpush3.bf16.msra.mxu0 %v476_v13 }
  0x43   :  { %442 = vmatprep.subr.bf16.mxu0 %v582_v0 }
  0x45   :  { %425 = vmatpush3.bf16.msra.mxu1 %v470_v7 }
  0x46   :  { %426 = vmatprep.subr.bf16.mxu1 %v582_v0  ;;  %443 = vmatpush3.bf16.msra.mxu0 %v477_v14 }
  0x47   :  { %444 = vmatprep.subr.bf16.mxu0 %v582_v0 }
  0x49   :  { %427 = vmatpush3.bf16.msra.mxu1 %v471_v8 }
  0x4a   :  { %428 = vmatprep.subr.bf16.mxu1 %v582_v0  ;;  %445 = vmatpush3.bf16.msra.mxu0 %v478_v15 }
  0x4b   :  { %446 = vmatprep.subr.bf16.mxu0 %v582_v0 }
  0x4d   :  { %429 = vmatpush3.bf16.msra.mxu1 %v472_v9 }
  0x4e   :  { %430 = vmatprep.subr.bf16.mxu1 %v582_v0  ;;  %447 = vmatpush3.bf16.msra.mxu0 %v479_v16 }
  0x4f   :  { %448 = vmatprep.subr.bf16.mxu0 %v582_v0 }
  0x51   :  { %431 = vmatpush3.bf16.msra.mxu1 %v473_v10 }
  0x52   :  { %432 = vmatprep.subr.bf16.mxu1 %v582_v0  ;;  %449 = vmatpush3.bf16.msra.mxu0 %v480_v17 }
  0x53   :  { %450 = vmatprep.subr.bf16.mxu0 %v582_v0 }
  0x55   :  { %433 = vmatpush3.bf16.msra.mxu1 %v474_v11 }
  0x56   :  { %451 = vmatpush3.bf16.msra.mxu0 %v481_v27 }
  0x57   :  { %452 = vmatprep.subr.bf16.mxu0 %v582_v0 }
  0x5a   :  { %453 = vmatpush3.bf16.msra.mxu0 %v482_v28 }
 0x10f   :  { %v113_v19 = vpop.f32.mrb[0].mxu0 }
 0x110   :  { %v114_v20 = vadd.f32 %v369_v18, %v113_v19  ;;  %v416_v21 = vpop.f32.mrb[1].mxu0 }
 0x111   :  { %v116_v22 = vpop.f32.mrb[2].mxu0 }
 0x112   :  { %vm119_vm2 = vcmp.ge.f32.partialorder %v114_v20, 0.0  ;;  %v120_v23 = vmul.f32 0.2, %v114_v20  ;;  %v417_v24 = vpop.f32.mrb[3].mxu0 }
 0x114   :  { %v121_v25 = vsel %vm119_vm2, %v114_v20, %v120_v23 }
 0x115   :  { %v122_v26 = vpack.c.bf16 %v121_v25, %v121_v25 }
 0x117   :  { %435 = vmatmul.mubr.bf16.vlgmr.msra.gmra.mrb[0].mxu1 %v122_v26 }
 0x1ea   :  { %v229_v30 = vpop.f32.mrb[0].mxu1 }
 0x1eb   :  { %v230_v31 = vadd.f32 %v373_v29, %v229_v30  ;;  %v436_v32 = vpop.f32.mrb[1].mxu1 }
 0x1ec   :  { %v232_v33 = vpop.f32.mrb[2].mxu1 }
 0x1ed   :  { %vm235_vm3 = vcmp.ge.f32.partialorder %v230_v31, 0.0  ;;  %v236_v34 = vmul.f32 0.2, %v230_v31  ;;  %v437_v35 = vpop.f32.mrb[3].mxu1 }
 0x1ef   :  { %v237_v36 = vsel %vm235_vm3, %v230_v31, %v236_v34 }
 0x1f0   :  { %v238_v37 = vpack.c.bf16 %v237_v36, %v237_v36 }
 0x1f2   :  { %455 = vmatmul.mubr.bf16.vlgmr.msra.gmra.mrb[4].mxu0 %v238_v37 }
 0x2c5   :  { %v346_v39 = vpop.f32.mrb[4].mxu0 }
 0x2c6   :  { %v347_v40 = vadd.f32 %v383_v38, %v346_v39  ;;  %v456_v41 = vpop.f32.mrb[5].mxu0 }
 0x2c7   :  { %v349_v42 = vpop.f32.mrb[6].mxu0 }
 0x2c8   :  { %352 = vst [vmem:[#allocation8] sm:$0xff] %v347_v40  ;;  %v457_v43 = vpop.f32.mrb[7].mxu0 }
 0x2c9   :  { %560 = shalt.err (!%p557_p0)
}
 0x2ca   :  { %s561_s3 = scalar_lea.hbm %s697_s4, 128 }
 0x2cb   :  { %p562_p1 = scmp.ne.s32.totalorder %s697_s4, %s561_s3  ;;  %p565_p2 = scmp.lt.u32.totalorder %s561_s3, %s697_s4 }
 0x2cd   :  { %p567_p3 = pnand %p565_p2, %p562_p1 }
 0x2cf   :  { %570 = shalt.err (!%p567_p3)
}
 0x2d0   :  { %362 = dma.vmem_to_hbm [thread:$0]  %s360_s5, 128, %s697_s4, [#allocation4]  }
 0x2d1   :  { %575 = dma.done.wait [#allocation4], 128  }
 0x2d2   :  { %576 = vsyncadd [#allocation4], 4294967168 }
 0x2d3   :  { %366 = vsyncpa [#allocation3], 1 }
 0x2d4   :  { %367 = vsyncpa [#allocation6], 1 }
 0x2d5   :  { %368 = vsyncpa [#allocation4], 1 }

</bundles_post_ra>
